<compile_context>
chip_gen: v7x
topology: tpu7x:2x2x1
jax: 0.10.0
libtpu: 0.0.40
codegen_flags: <defaults>
</compile_context>

<pallas_src>
import functools

import jax
import jax.numpy as jnp
from jax.experimental import pallas as pl
from jax.experimental.pallas import tpu as pltpu


def _round_up(n, m):
    return ((n + m - 1) // m) * m


# ----------------------------- Pallas kernel --------------------------------
def _deeprec_kernel(xT_ref, p_ref, out_ref, *, n_feat, n_in_pad, k_total,
                    k_pad):
    """Fused gather (as selection-matmul multi-hot) + 3-layer MLP.

    xT_ref : (n_in_pad, TILE_B) f32 -- rows 0..8 integer ids, row 9 time,
             rows 10..15 zero padding (keeps the MXU contraction dim aligned).
    p_ref  : (k_pad + 16, Lp) f32 parameter slab:
               [0:k_pad,        0:n_in_pad ] = S     (0/1 row-routing matrix)
               [0:k_pad,        n_in_pad   ] = lidx  (local row idx, -1 = none)
               [k_pad:k_pad+8,  0:k_total  ] = W1e   (W1 folded with tables)
               [k_pad:k_pad+8,  k_pad      ] = b1
               [k_pad+8:+16,    0:8        ] = W2
               [k_pad+8:+16,    8          ] = b2
               [k_pad+8:+16,    9          ] = W3
               [k_pad+8,        10         ] = b3
    out_ref: (1, TILE_B) f32 -- sigmoid probabilities (lane dense).
    """
    x = xT_ref[...]                                         # (n_in_pad, T)
    time = x[n_feat:n_feat + 1, :]                          # (1, T)

    # Parameter slices (static; slab is VMEM resident across all grid steps).
    sel_mat = p_ref[0:k_pad, 0:n_in_pad]                    # (k_pad, n_in_pad)
    lidx = p_ref[0:k_pad, n_in_pad:n_in_pad + 1]            # (k_pad, 1)
    w1e = p_ref[k_pad:k_pad + 8, 0:k_pad]                   # (8, k_pad)
    b1 = p_ref[k_pad:k_pad + 8, k_pad:k_pad + 1]            # (8, 1)
    w_time = p_ref[k_pad:k_pad + 8, k_total - 1:k_total]    # (8, 1)
    w2 = p_ref[k_pad + 8:k_pad + 16, 0:8]                   # (8, 8)
    b2 = p_ref[k_pad + 8:k_pad + 16, 8:9]                   # (8, 1)
    w3 = p_ref[k_pad + 8:k_pad + 16, 9:10]                  # (8, 1)
    b3 = p_ref[k_pad + 8:k_pad + 9, 10:11]                  # (1, 1)

    # Row routing on the MXU: sel[k, b] = id value of the feature owning
    # global table row k (0 for the time / padding rows).
    sel = jnp.dot(sel_mat, x, preferred_element_type=jnp.float32)  # (k_pad, T)
    # Single VPU compare -> multi-hot mask. lidx = -1 on time/padding rows so
    # they stay 0; the 0.5 tolerance guards against any MXU rounding.
    m = jnp.where(jnp.abs(sel - lidx) < 0.5, 1.0, 0.0)             # (k_pad, T)

    # 3-layer MLP in batch-on-lanes layout; the first Linear is pre-folded
    # with the embedding tables, so h1 == relu(W1 @ concat(emb..., time) + b1).
    h1 = jnp.dot(w1e, m, preferred_element_type=jnp.float32)       # (8, T)
    h1 = jnp.maximum(h1 + w_time * time + b1, 0.0)
    h2 = jnp.maximum(
        jnp.dot(w2, h1, preferred_element_type=jnp.float32) + b2, 0.0)
    # Last layer: VPU multiply + cross-sublane reduce (no N=1 MXU pass).
    logit = jnp.sum(w3 * h2, axis=0, keepdims=True) + b3            # (1, T)
    out_ref[...] = jax.nn.sigmoid(logit)


def deeprec_forward_pallas(xT, param_slab, *, n_feat, n_in_pad, k_total,
                           k_pad, tile_b):
    """xT: (n_in_pad, B_pad) f32, B_pad % tile_b == 0. Returns (1, B_pad)."""
    n_in, b_pad = xT.shape
    assert n_in == n_in_pad and b_pad % tile_b == 0
    kernel = functools.partial(
        _deeprec_kernel, n_feat=n_feat, n_in_pad=n_in_pad, k_total=k_total,
        k_pad=k_pad)
    flops = 2 * b_pad * (k_pad * n_in_pad + 8 * k_pad + 8 * 8 + 8)
    cost = pl.CostEstimate(
        flops=flops,
        transcendentals=b_pad,
        bytes_accessed=4 * ((n_in_pad + 1) * b_pad + int(param_slab.size)))
    return pl.pallas_call(
        kernel,
        out_shape=jax.ShapeDtypeStruct((1, b_pad), jnp.float32),
        grid=(b_pad // tile_b,),
        in_specs=[
            # per-step batch tile of the (padded, transposed) raw features
            pl.BlockSpec((n_in_pad, tile_b), lambda i: (0, i)),
            # parameter slab: constant index_map -> stays VMEM resident
            pl.BlockSpec(param_slab.shape, lambda i: (0, 0)),
        ],
        out_specs=pl.BlockSpec((1, tile_b), lambda i: (0, i)),
        compiler_params=pltpu.CompilerParams(
            dimension_semantics=("parallel",)),
        cost_estimate=cost,
    )(xT, param_slab)


# ------------------------------ Model glue -----------------------------------
class DeepRecModelPallas:
    N_FEAT = 9      # number of id features
    N_IN = 10       # 9 ids + 1 time column in the raw input
    N_IN_PAD = 16   # sublane-aligned feature rows fed to the kernel

    def __init__(self, num_embeddings, embedding_dims, key, max_tile_b=8192):
        ks = jax.random.split(key, 16)
        n = lambda k, shape, scale=0.1: (scale * jax.random.normal(k, shape)
                                         ).astype(jnp.float32)

        # Embedding tables (same shapes as the PyTorch nn.Embedding modules).
        # NOTE: color/size/material use embedding_dims[...] as the vocab size,
        # faithful to the original module (upstream modeling quirk).
        self.user_emb = n(ks[0], (num_embeddings['user_id'] + 1, 4))
        self.product_emb = n(ks[1], (num_embeddings['product_id'] + 1, 4))
        self.model_emb = n(ks[2], (num_embeddings['model_id'] + 1, 4))
        self.gender_emb = n(ks[3], (num_embeddings['gender'] + 1, 2))
        self.age_emb = n(ks[4], (num_embeddings['age_group'] + 1, 4))
        self.residence_emb = n(ks[5], (num_embeddings['residence_type'] + 1, 3))
        self.color_emb = n(ks[6], (embedding_dims['색상'] + 1,
                                   embedding_dims['색상']))
        self.size_emb = n(ks[7], (embedding_dims['사이즈'] + 1,
                                  embedding_dims['사이즈']))
        self.material_emb = n(ks[8], (embedding_dims['소재'] + 1,
                                      embedding_dims['소재']))
        self.tables = [self.user_emb, self.product_emb, self.model_emb,
                       self.gender_emb, self.age_emb, self.residence_emb,
                       self.color_emb, self.size_emb, self.material_emb]

        total_input_dim = (4 * 3 + 2 + 4 + 3
                           + embedding_dims['색상']
                           + embedding_dims['사이즈']
                           + embedding_dims['소재'] + 1)
        self.total_input_dim = total_input_dim

        # MLP params in PyTorch orientation ([out, in]).
        self.w1 = n(ks[9], (8, total_input_dim), 0.2)
        self.b1 = n(ks[10], (8,), 0.2)
        self.w2 = n(ks[11], (8, 8), 0.2)
        self.b2 = n(ks[12], (8,), 0.2)
        self.w3 = n(ks[13], (1, 8), 0.2)
        self.b3 = n(ks[14], (1,), 0.2)

        # ---- derived, precomputed once -------------------------------------
        offs, r = [], 0
        for t in self.tables:
            offs.append(r)
            r += t.shape[0]
        self.row_offsets = tuple(offs)
        self.k_total = r + 1                       # + 1 time passthrough row
        self.k_pad = _round_up(self.k_total, 8)

        # Fold the tables into the first Linear: W1e = W1 @ E^T.
        d = total_input_dim
        e_mat = jnp.zeros((self.k_total, d), jnp.float32)
        col = 0
        for t, r0 in zip(self.tables, self.row_offsets):
            v, e = t.shape
            e_mat = e_mat.at[r0:r0 + v, col:col + e].set(t)
            col += e
        e_mat = e_mat.at[self.k_total - 1, d - 1].set(1.0)   # time column
        w1e = self.w1 @ e_mat.T                              # (8, k_total)

        # Selection matrix S (routes id rows of x onto global table rows) and
        # local-row-index column lidx (one compare builds the multi-hot).
        sel_mat = jnp.zeros((self.k_pad, self.N_IN_PAD), jnp.float32)
        lidx = jnp.full((self.k_pad,), -1.0, jnp.float32)
        for f, (t, r0) in enumerate(zip(self.tables, self.row_offsets)):
            v = t.shape[0]
            sel_mat = sel_mat.at[r0:r0 + v, f].set(1.0)
            lidx = lidx.at[r0:r0 + v].set(jnp.arange(v, dtype=jnp.float32))

        # Pack everything into one (k_pad + 16, Lp) slab (single resident DMA).
        lp = max(128, _round_up(self.k_pad + 1, 128))
        slab = jnp.zeros((self.k_pad + 16, lp), jnp.float32)
        slab = slab.at[0:self.k_pad, 0:self.N_IN_PAD].set(sel_mat)
        slab = slab.at[0:self.k_pad, self.N_IN_PAD].set(lidx)
        slab = slab.at[self.k_pad:self.k_pad + 8, 0:self.k_total].set(w1e)
        slab = slab.at[self.k_pad:self.k_pad + 8, self.k_pad].set(self.b1)
        slab = slab.at[self.k_pad + 8:self.k_pad + 16, 0:8].set(self.w2)
        slab = slab.at[self.k_pad + 8:self.k_pad + 16, 8].set(self.b2)
        slab = slab.at[self.k_pad + 8:self.k_pad + 16, 9].set(self.w3[0])
        slab = slab.at[self.k_pad + 8, 10].set(self.b3[0])
        self.param_slab = slab

        # Round max_tile_b down to a power of two so bucketed b_pad divides it.
        mt = 128
        while mt * 2 <= max_tile_b:
            mt *= 2
        self.max_tile_b = mt

    def _tiling(self, b):
        # Bucket the padded batch to a power of two (>= 256) so tile_b and the
        # grid extent are compile-time stable, and keep an even number (>= 2)
        # of grid steps so v7x's two TensorCores get balanced work.
        b_pad = 256
        while b_pad < b:
            b_pad *= 2
        tile_b = min(self.max_tile_b, b_pad // 2)
        return tile_b, b_pad

    def __call__(self, x):
        # x: [B, 10] f32; cols 0..8 integer-valued ids, col 9 float time.
        b = x.shape[0]
        tile_b, b_pad = self._tiling(b)
        # Single pad-of-transpose (no zeros+set materialization); padded
        # columns carry id 0 / time 0 and are sliced off at the end.
        xT = jnp.pad(jnp.asarray(x, jnp.float32).T,
                     ((0, self.N_IN_PAD - self.N_IN), (0, b_pad - b)))
        out = deeprec_forward_pallas(
            xT, self.param_slab,
            n_feat=self.N_FEAT, n_in_pad=self.N_IN_PAD,
            k_total=self.k_total, k_pad=self.k_pad, tile_b=tile_b)
        return out[0, :b]                                   # matches .squeeze()


# ------------------------------ Reference ------------------------------------
def reference_forward(model, x):
    """Pure-JAX reference (unfolded params, gather + concat + MLP)."""
    idx = x[:, :9].astype(jnp.int32)
    time = x[:, 9:10]
    parts = [t[idx[:, f]] for f, t in enumerate(model.tables)]
    feat = jnp.concatenate(parts + [time], axis=-1).astype(jnp.float32)
    h1 = jnp.maximum(feat @ model.w1.T + model.b1, 0.0)
    h2 = jnp.maximum(h1 @ model.w2.T + model.b2, 0.0)
    return jax.nn.sigmoid(h2 @ model.w3.T + model.b3)[:, 0]


# -------------------------------- Main ----------------------------------------
if __name__ == "__main__":
    key = jax.random.PRNGKey(0)
    k_model, k_small, k_big = jax.random.split(key, 3)

    num_embeddings = {
        'user_id': 10, 'product_id': 12, 'model_id': 7,
        'gender': 2, 'age_group': 5, 'residence_type': 3,
    }
    embedding_dims = {'색상': 5, '사이즈': 3, '소재': 4}
    # total_input_dim = 12 + 2 + 4 + 3 + 5 + 3 + 4 + 1 = 34

    model = DeepRecModelPallas(num_embeddings, embedding_dims, k_model)

    maxes = jnp.array([
        num_embeddings['user_id'], num_embeddings['product_id'],
        num_embeddings['model_id'], num_embeddings['gender'],
        num_embeddings['age_group'], num_embeddings['residence_type'],
        embedding_dims['색상'], embedding_dims['사이즈'], embedding_dims['소재'],
    ], dtype=jnp.int32)

    def make_batch(k, b):
        k1, k2 = jax.random.split(k)
        ids = jax.random.randint(k1, (b, 9), 0, 1_000_000) % (maxes + 1)
        t = jax.random.uniform(k2, (b, 1), dtype=jnp.float32)
        return jnp.concatenate([ids.astype(jnp.float32), t], axis=-1)  # [b, 10]

    # Small batch (matches typical module usage).
    x_small = make_batch(k_small, 8)
    out_small = jax.block_until_ready(model(x_small))
    ref_small = jax.block_until_ready(reference_forward(model, x_small))
    assert out_small.shape == (8,), f"bad output shape {out_small.shape}"
    assert jnp.allclose(out_small, ref_small, atol=1e-5, rtol=1e-5), \
        "small-batch mismatch vs reference"

    # Larger batch: exercises a multi-step grid and tail padding.
    x_big = make_batch(k_big, 1200)
    out_big = jax.block_until_ready(model(x_big))
    ref_big = jax.block_until_ready(reference_forward(model, x_big))
    assert out_big.shape == (1200,), f"bad output shape {out_big.shape}"
    assert jnp.allclose(out_big, ref_big, atol=1e-5, rtol=1e-5), \
        "large-batch mismatch vs reference"

    print("KERNEL_OK")
</pallas_src>

<mosaic_0001>
module attributes {stable_mosaic.version = 11 : i64} {
  func.func @_deeprec_kernel(%arg0: i32, %arg1: memref<16x128xf32, #tpu.memory_space<vmem>>, %arg2: memref<80x128xf32, #tpu.memory_space<vmem>>, %arg3: memref<1x128xf32, #tpu.memory_space<vmem>>) attributes {dimension_semantics = [#tpu.dimension_semantics<parallel>], iteration_bounds = array<i64: 2>, scalar_prefetch = 0 : i64, scratch_operands = 0 : i64, tpu.core_type = #tpu.core_type<tc>, window_params = [{transform_indices = @transform_0, window_bounds = array<i64: 16, 128>}, {pipeline_mode = #tpu.pipeline_mode<synchronous>, transform_indices = @transform_1, window_bounds = array<i64: 80, 128>}, {transform_indices = @transform_2, window_bounds = array<i64: 1, 128>}]} {
    %c0 = arith.constant 0 : index
    %c0_0 = arith.constant 0 : index
    %0 = vector.load %arg1[%c0, %c0_0] : memref<16x128xf32, #tpu.memory_space<vmem>>, vector<16x128xf32>
    %1 = vector.extract_strided_slice %0 {offsets = [9, 0], sizes = [1, 128], strides = [1, 1]} : vector<16x128xf32> to vector<1x128xf32>
    %c0_1 = arith.constant 0 : index
    %c0_2 = arith.constant 0 : index
    %2 = vector.load %arg2[%c0_1, %c0_2] : memref<80x128xf32, #tpu.memory_space<vmem>>, vector<64x16xf32>
    %c0_3 = arith.constant 0 : index
    %c16 = arith.constant 16 : index
    %3 = vector.load %arg2[%c0_3, %c16] : memref<80x128xf32, #tpu.memory_space<vmem>>, vector<64x1xf32>
    %c64 = arith.constant 64 : index
    %c0_4 = arith.constant 0 : index
    %4 = vector.load %arg2[%c64, %c0_4] : memref<80x128xf32, #tpu.memory_space<vmem>>, vector<8x64xf32>
    %c64_5 = arith.constant 64 : index
    %c64_6 = arith.constant 64 : index
    %5 = vector.load %arg2[%c64_5, %c64_6] : memref<80x128xf32, #tpu.memory_space<vmem>>, vector<8x1xf32>
    %c64_7 = arith.constant 64 : index
    %c60 = arith.constant 60 : index
    %6 = vector.load %arg2[%c64_7, %c60] : memref<80x128xf32, #tpu.memory_space<vmem>>, vector<8x1xf32>
    %c72 = arith.constant 72 : index
    %c0_8 = arith.constant 0 : index
    %7 = vector.load %arg2[%c72, %c0_8] : memref<80x128xf32, #tpu.memory_space<vmem>>, vector<8x8xf32>
    %c72_9 = arith.constant 72 : index
    %c8 = arith.constant 8 : index
    %8 = vector.load %arg2[%c72_9, %c8] : memref<80x128xf32, #tpu.memory_space<vmem>>, vector<8x1xf32>
    %c72_10 = arith.constant 72 : index
    %c9 = arith.constant 9 : index
    %9 = vector.load %arg2[%c72_10, %c9] : memref<80x128xf32, #tpu.memory_space<vmem>>, vector<8x1xf32>
    %c72_11 = arith.constant 72 : index
    %c10 = arith.constant 10 : index
    %10 = vector.load %arg2[%c72_11, %c10] : memref<80x128xf32, #tpu.memory_space<vmem>>, vector<1x1xf32>
    %cst = arith.constant dense<0.000000e+00> : vector<64x128xf32>
    %11 = tpu.matmul %2, %0, %cst {dimension_numbers = #tpu.dot_dimension_numbers<[1], [0], [0], [1], [0, 0, 1, 1], [], []>} : vector<64x16xf32>, vector<16x128xf32>, vector<64x128xf32> -> vector<64x128xf32>
    %12 = vector.broadcast %3 : vector<64x1xf32> to vector<64x128xf32>
    %13 = arith.subf %11, %12 : vector<64x128xf32>
    %14 = math.absf %13 : vector<64x128xf32>
    %cst_12 = arith.constant 5.000000e-01 : f32
    %15 = vector.broadcast %cst_12 : f32 to vector<64x128xf32>
    %16 = arith.cmpf olt, %14, %15 : vector<64x128xf32>
    %cst_13 = arith.constant 1.000000e+00 : f32
    %cst_14 = arith.constant 0.000000e+00 : f32
    %17 = vector.broadcast %cst_13 : f32 to vector<64x128xf32>
    %18 = vector.broadcast %cst_14 : f32 to vector<64x128xf32>
    %19 = arith.select %16, %17, %18 : vector<64x128xi1>, vector<64x128xf32>
    %cst_15 = arith.constant dense<0.000000e+00> : vector<8x128xf32>
    %20 = tpu.matmul %4, %19, %cst_15 {dimension_numbers = #tpu.dot_dimension_numbers<[1], [0], [0], [1], [0, 0, 1, 1], [], []>} : vector<8x64xf32>, vector<64x128xf32>, vector<8x128xf32> -> vector<8x128xf32>
    %21 = vector.broadcast %6 : vector<8x1xf32> to vector<8x128xf32>
    %22 = vector.broadcast %1 : vector<1x128xf32> to vector<8x128xf32>
    %23 = arith.mulf %21, %22 : vector<8x128xf32>
    %24 = arith.addf %20, %23 : vector<8x128xf32>
    %25 = vector.broadcast %5 : vector<8x1xf32> to vector<8x128xf32>
    %26 = arith.addf %24, %25 : vector<8x128xf32>
    %cst_16 = arith.constant 0.000000e+00 : f32
    %27 = vector.broadcast %cst_16 : f32 to vector<8x128xf32>
    %28 = arith.maximumf %26, %27 : vector<8x128xf32>
    %cst_17 = arith.constant dense<0.000000e+00> : vector<8x128xf32>
    %29 = tpu.matmul %7, %28, %cst_17 {dimension_numbers = #tpu.dot_dimension_numbers<[1], [0], [0], [1], [0, 0, 1, 1], [], []>} : vector<8x8xf32>, vector<8x128xf32>, vector<8x128xf32> -> vector<8x128xf32>
    %30 = vector.broadcast %8 : vector<8x1xf32> to vector<8x128xf32>
    %31 = arith.addf %29, %30 : vector<8x128xf32>
    %cst_18 = arith.constant 0.000000e+00 : f32
    %32 = vector.broadcast %cst_18 : f32 to vector<8x128xf32>
    %33 = arith.maximumf %31, %32 : vector<8x128xf32>
    %34 = vector.broadcast %9 : vector<8x1xf32> to vector<8x128xf32>
    %35 = arith.mulf %34, %33 : vector<8x128xf32>
    %cst_19 = arith.constant dense<0.000000e+00> : vector<128xf32>
    %36 = vector.multi_reduction <add>, %35, %cst_19 [0] : vector<8x128xf32> to vector<128xf32>
    %37 = vector.shape_cast %36 : vector<128xf32> to vector<1x128xf32>
    %38 = vector.broadcast %10 : vector<1x1xf32> to vector<1x128xf32>
    %39 = arith.addf %37, %38 : vector<1x128xf32>
    %40 = arith.negf %39 : vector<1x128xf32>
    %41 = math.exp %40 : vector<1x128xf32>
    %cst_20 = arith.constant 1.000000e+00 : f32
    %42 = vector.broadcast %cst_20 : f32 to vector<1x128xf32>
    %43 = arith.addf %42, %41 : vector<1x128xf32>
    %44 = arith.divf %42, %43 : vector<1x128xf32>
    %c0_21 = arith.constant 0 : index
    %c0_22 = arith.constant 0 : index
    %45 = vector.load %arg3[%c0_21, %c0_22] : memref<1x128xf32, #tpu.memory_space<vmem>>, vector<1x128xf32>
    tpu.vector_store %arg3[%c0_21, %c0_22], %44 {strides = array<i32>} : memref<1x128xf32, #tpu.memory_space<vmem>>, vector<1x128xf32>,
    return
  }
  func.func @transform_0(%arg0: i32) -> (i32, i32) {
    %c0_i32 = arith.constant 0 : i32
    %c0_i32_0 = arith.constant 0 : i32
    return %c0_i32, %arg0 : i32, i32
  }
  func.func @transform_1(%arg0: i32) -> (i32, i32) {
    %c0_i32 = arith.constant 0 : i32
    %c0_i32_0 = arith.constant 0 : i32
    %c0_i32_1 = arith.constant 0 : i32
    return %c0_i32, %c0_i32_0 : i32, i32
  }
  func.func @transform_2(%arg0: i32) -> (i32, i32) {
    %c0_i32 = arith.constant 0 : i32
    %c0_i32_0 = arith.constant 0 : i32
    return %c0_i32, %arg0 : i32, i32
  }
}

</mosaic_0001>

<bundles_post_ra>
// kernel: tpu_custom_call.1
= control target key start
LH: loop header
LB: loop body
LE: loop exit
PB: predicated region body
PF: predicated region fallthrough
CT: control target
= control target key end

     0   :  { %7 = vsyncpa [#allocation3], 0  ;;  %s1230_s0 = inlined_call_operand.hbm [shape: f32[16,256], index: 0, kind: input, shape index: {}]   ;;  %s1231_s1 = inlined_call_operand.hbm [shape: f32[80,128], index: 1, kind: input, shape index: {}]   ;;  %s1232_s2 = inlined_call_operand.hbm [shape: f32[1,256], index: 2, kind: output, shape index: {}]  }
   0x1   :  { %9 = vsyncpa [#allocation3 + $0x1], 0 }
   0x2   :  { %10 = vsyncpa [#allocation6], 0 }
   0x3   :  { %11 = vsyncpa [#allocation4], 0 }
   0x4   :  { %13 = vsyncpa [#allocation4 + $0x1], 0  ;;  %s1014_s9 = smov 0   ;;  %s1016_s10 = smov 0  }
   0x5   :  { %s1018_s11 = smov 0   ;;  %s1020_s12 = smov 0  }
   0x6 LB: > { %s1035_s13 = sadd.s32 4294967295, %s981_s12   ;;  %s663_s14 = sadd.s32 4294967294, %s981_s12   ;;  %s981_s12 = sphi %s1020_s12, %s1256_s12   ;;  %s977_s11 = sphi %s1018_s11, %s1255_s11   ;;  %s973_s10 = sphi %s1016_s10, %s1254_s10   ;;  %s969_s9 = sphi %s1014_s9, %s1253_s9  }
   0x7   : > { %s1039_s15 = sadd.s32 1, %s981_s12   ;;  %s26_s16 = sadd.s32 1, %s977_s11 }
   0x8   : > { %s23_s17 = ssub.s32 %s981_s12, %s1039_s15  ;;  %p33_p0 = scmp.ne.s32.totalorder %s977_s11, %s973_s10 }
   0x9   : > { %p24_p1 = scmp.eq.s32.totalorder %s23_s17, 0  ;;  %p34_p2 = scmp.eq.s32.totalorder %s981_s12, 0 }
   0xa   : > { %p39_p3 = scmp.ne.s32.totalorder %s973_s10, %s969_s9  ;;  %p1233_p4 = scmp.eq.s32.totalorder %s1035_s13, 0 }
   0xb   : > { %s1051_s18 = scalar_select %p24_p1, %s977_s11, %s26_s16  }
   0xc   : > { %p1053_p5 = por %p34_p2, %p33_p0  ;;  %p1059_p6 = por %p1233_p4, %p39_p3 }
   0xd   : > { %p84_p7 = scmp.eq.s32.totalorder %s1035_s13, 1  ;;  %p90_p8 = scmp.eq.s32.totalorder %s663_s14, 1 }
   0xe   : > { %s1237_s19 = scalar_select %p1053_p5, 1, 0 }
   0xf   : > { %s1238_s20 = scalar_select %p1059_p6, 1, 0 }
  0x10   : > { %p664_p9 = scmp.ge.s32.totalorder %s981_s12, 1  ;;  %p97_p10 = scmp.lt.s32.totalorder %s981_s12, 3 }
  0x11   : > { %p1066_p11 = por %p84_p7, %p33_p0  ;;  %p1070_p12 = por %p90_p8, %p39_p3 }
  0x12   : > { %p1074_p13 = pnand %p664_p9, %p97_p10  ;;  %s983_s24 = smov [#allocation5]  }
  0x13   : > { %s1239_s21 = scalar_select %p1066_p11, 1, 0 }
  0x14   : > { %s1240_s22 = scalar_select %p1070_p12, 1, 0 }
  0x15   : > { %s1241_s23 = scalar_select %p1074_p13, 1, 0 }
  0x16   : > { %p779_p1 = pneg %p1074_p13  ;;  %s109_s25 = sshll.u32 %s983_s24, 4  ;;  %s110_s25 = int_to_ptr.vmem [resolvable:$true] %s109_s25 }
  0x17   : > { %s123_s27 = sand.u32 1, %s977_s11   ;;  %s853_s30 = scalar_lea.hbm %s1231_s1, 1280 }
  0x18   : > { %p1082_p2 = pnand %p779_p1, %p1233_p4  ;;  %p854_p7 = scmp.ne.s32.totalorder %s1231_s1, %s853_s30 }
  0x19   : > { %p860_p1 = scmp.lt.u32.totalorder %s853_s30, %s1231_s1 }
  0x1a   : > { %p855_p8 = pneg %p1082_p2 }
  0x1c   : > { %p856_p9 = pnand %p855_p8, %p854_p7 }
  0x1e   : > { %p857_p10 = pneg %p856_p9 }
  0x20   : > { %p862_p4 = pnand %p860_p1, %p857_p10 }
  0x22   : > { %865 = shalt.err (!%p862_p4)
}
  0x23   : > { %s866_s7 = scalar_lea.vmem %s110_s25, 1280  ;;  %p874_p11 = scmp.lt.s32.totalorder %s110_s25, %s110_s25 }
  0x24   : > { %p867_p0 = scmp.ne.s32.totalorder %s110_s25, %s866_s7  ;;  %p875_p6 = scmp.lt.s32.totalorder %s866_s7, %s866_s7 }
  0x26   : > { %p869_p3 = pnand %p867_p0, %p855_p8  ;;  %p876_p13 = por %p875_p6, %p874_p11 }
  0x28   : > { %p870_p12 = pneg %p869_p3 }
  0x2a   : > { %p877_p5 = pnand %p876_p13, %p870_p12 }
  0x2c   : > { %880 = shalt.err (!%p877_p5)
}
  0x2d   : > { %s984_s8 = smov 128   ;;  %s985_s14 = smov 8  }
  0x2e   : > { %782 = dma.hbm_to_vmem [thread:$0]  (!%p1082_p2), %s1231_s1, 1280, %s110_s25, [#allocation6], %s984_s8, %s984_s8, %s985_s14  }
  0x2f   : > { %p1243_p4 = scmp.ne.s32.totalorder %s1237_s19, 0  ;;  %p1244_p0 = scmp.lt.s32.totalorder %s981_s12, 2 }
  0x30   : > { %s667_s28 = sshll.u32 %s123_s27, 4  ;;  %s668_s29 = sshll.u32 %s981_s12, 7 }
  0x31   : > { %p1112_p3 = pnand %p1244_p0, %p1243_p4  ;;  %s1120_s26 = scalar_lea.hbm %s1230_s0, %s668_s29 }
  0x32   : > { %s127_s25 = scalar_lea.vmem [#allocation2], %s667_s28  ;;  %s1124_s4 = scalar_lea.sflag [#allocation3], %s123_s27 }
  0x33   : > { %s133_s19 = sshll.u32 %s127_s25, 4  ;;  %s881_s5 = scalar_lea.hbm %s1120_s26, 256  ;;  %s1122_s19 = int_to_ptr.vmem [resolvable:$true] %s133_s19 }
  0x34   : > { %p882_p5 = scmp.ne.s32.totalorder %s1120_s26, %s881_s5  ;;  %p883_p6 = pneg %p1112_p3 }
  0x35   : > { %s886_s16 = scalar_lea.hbm %s1230_s0, 512  ;;  %p887_p13 = scmp.lt.u32.totalorder %s1120_s26, %s1230_s0 }
  0x36   : > { %p884_p11 = pnand %p883_p6, %p882_p5  ;;  %p888_p2 = scmp.lt.u32.totalorder %s886_s16, %s881_s5 }
  0x37   : > { %p890_p8 = scmp.lt.u32.totalorder %s881_s5, %s1120_s26 }
  0x38   : > { %p885_p12 = pneg %p884_p11  ;;  %p889_p7 = por %p888_p2, %p887_p13 }
  0x3a   : > { %p891_p9 = por %p890_p8, %p889_p7 }
  0x3c   : > { %p892_p10 = pnand %p891_p9, %p885_p12 }
  0x3e   : > { %895 = shalt.err (!%p892_p10)
}
  0x3f   : > { %s896_s27 = scalar_lea.vmem %s1122_s19, 256  ;;  %s986_s28 = smov [#allocation2]  }
  0x40   : > { %p897_p1 = scmp.ne.s32.totalorder %s1122_s19, %s896_s27  ;;  %s901_s30 = sshll.u32 %s986_s28, 4  ;;  %s902_s30 = int_to_ptr.vmem [resolvable:$false] %s901_s30 }
  0x41   : > { %s903_s3 = scalar_lea.vmem %s902_s30, 512  ;;  %p904_p5 = scmp.lt.s32.totalorder %s1122_s19, %s902_s30 }
  0x42   : > { %p899_p4 = pnand %p897_p1, %p883_p6  ;;  %p905_p11 = scmp.lt.s32.totalorder %s903_s3, %s896_s27 }
  0x44   : > { %p900_p0 = pneg %p899_p4  ;;  %p906_p13 = por %p905_p11, %p904_p5 }
  0x46   : > { %p907_p2 = pnand %p906_p13, %p900_p0 }
  0x48   : > { %910 = shalt.err (!%p907_p2)
}
  0x49   : > { %s987_s25 = smov 256   ;;  %p1246_p6 = scmp.ne.s32.totalorder %s1241_s23, 0 }
  0x4a   : > { %786 = dma.hbm_to_vmem [thread:$0]  (!%p1112_p3), %s1120_s26, 256, %s1122_s19, %s1124_s4, %s987_s25, %s984_s8, %s985_s14  }
  0x4b   : > { %145 = sbr.rel (%p1246_p6) target bundleno = 818 (0x332), region = 28  ;;  %s1157_s5 = sand.u32 (!%p1246_p6), 1, %s973_s10  }
  0x4c   : > { %s670_s6 = sshll.u32 (!%p1246_p6), %s1157_s5, 4  ;;  %s148_s7 = scalar_lea.sflag (!%p1246_p6), [#allocation3], %s1157_s5 }
  0x4d   : > { %s151_s16 = scalar_lea.vmem (!%p1246_p6), [#allocation2], %s670_s6  ;;  %p1247_p12 = scmp.ne.s32.totalorder (!%p1246_p6), %s1238_s20, 0 }
  0x52   : > { %956 = dma.done.wait (%p1247_p12), %s148_s7, 256  }
  0x53   : > { %958 = vsyncadd (%p1247_p12), %s148_s7, 4294967040  ;;  %p1248_p7 = scmp.eq.s32.totalorder %s1035_s13, 0 }
  0x55   : > { %960 = dma.done.wait (%p1248_p7), [#allocation6], 1280   ;;  %p1249_p3 = pmov %p1248_p7 }
  0x56   : > { %v988_v0 = vmov 16   ;;  %vm188_vm0 = vcmask 130048   ;;  %v175_v1 = vld [vmem:[%s151_s16] sm:$0xff]  ;;  %v1169_v2 = vld [vmem:[%s151_s16 + $0x8] sm:$0xff]  ;;  %v989_v12 = vmov 0.0|0.0   ;;  %vm990_vm1 = vmmov 0  }
  0x57   : > { %962 = vsyncadd (%p1249_p3), [#allocation6], 4294966016  ;;  %841 = vset.pattern.permute.xlu0 %v988_v0  ;;  %842 = vset.pattern.permute.xlu1 %v988_v0  ;;  %v177_v3 = vld [vmem:[#allocation5] sm:$0xff]  ;;  %v755_v4 = vpack.c.bf16 %v1169_v2, %v175_v1  ;;  %v179_v5 = vld [vmem:[#allocation5 + $0x10] sm:$0xff]  ;;  %v991_v13 = vmov 0.0   ;;  %v992_v15 = vmov 60   ;;  %v387_v55 = vlaneseq }
  0x58   : > { %719 = vmatprep.mubr.msk.f32.mxu0 %vm188_vm0, %v177_v3  ;;  %319 = vperm.xlu0 %841, %v177_v3   ;;  %v178_v6 = vld [vmem:[#allocation5 + $0x8] sm:$0xff]  ;;  %v180_v7 = vld [vmem:[#allocation5 + $0x18] sm:$0xff]  ;;  %v181_v8 = vld [vmem:[#allocation5 + $0x20] sm:$0xff]  ;;  %v993_v16 = vmov 64   ;;  %v994_v36 = vmov 1.0|1.0  }
  0x59   : > { %327 = vperm.xlu1 %842, %v179_v5   ;;  %756 = vmatprep.subr.bf16.mxu0 %v755_v4  ;;  %v182_v9 = vld [vmem:[#allocation5 + $0x28] sm:$0xff]  ;;  %v183_v10 = vld [vmem:[#allocation5 + $0x30] sm:$0xff]  ;;  %v184_v11 = vld [vmem:[#allocation5 + $0x38] sm:$0xff]  ;;  %vm392_vm14 = vcmask 523264   ;;  %v995_v51 = vmov 8   ;;  %v996_v52 = vmov 9  }
  0x5a   : > { %758 = vmatpush3.bf16.msra.mxu0 %v755_v4  ;;  %759 = vmatprep.subr.bf16.mxu1 %v989_v12  ;;  %v185_v14 = vld [vmem:[#allocation5 + $0x40] sm:$0xff]  ;;  %v186_v50 = vld [vmem:[#allocation5 + $0x48] sm:$0xff]  ;;  %v997_v54 = vmov 10   ;;  %v388_v56 = vshrl.u32 %v387_v55, 7  ;;  %vm476_vm15 = vcmask 64512   ;;  %s691_s20 = sshll.u32 %s1035_s13, 4 }
  0x5b   : > { %747 = vmatprep.mubr.msk.f32.mxu1 %vm990_vm1, %v991_v13  ;;  %750 = vmatprep.subr.mxu0 %v991_v13  ;;  %v187_v53 = vld [vmem:[#allocation5 + $0x48] sm:$0x1]  ;;  %s174_s23 = scalar_lea.vmem [#allocation7], %s1157_s5  ;;  %s1186_s26 = scalar_lea.hbm %s1232_s2, %s691_s20 }
  0x5c   : > { %323 = vperm.xlu0 %841, %v178_v6   ;;  %v389_v57 = vsub.s32 1, %v388_v56  ;;  %s587_s8 = sshll.u32 %s174_s23, 4  ;;  %s575_s19 = scalar_lea.sflag [#allocation4], %s1157_s5  ;;  %s1188_s8 = int_to_ptr.vmem [resolvable:$true] %s587_s8 }
  0x5d   : > { %331 = vperm.xlu1 %842, %v180_v7   ;;  %720 = vmatmul.mubr.msk.f32.vlgmr.msra.gmra.mrb[0].mxu0 %vm188_vm0, %v178_v6  ;;  %s911_s4 = scalar_lea.vmem %s1188_s8, 16  ;;  %p1250_p9 = scmp.ne.s32.totalorder %s1239_s21, 0 }
  0x5e   : > { %722 = vmatprep.mubr.msk.f32.mxu0 %vm188_vm0, %v179_v5  ;;  %v390_v58 = vrot.slane %v1169_v2, %v389_v57  ;;  %p912_p8 = scmp.ne.s32.totalorder %s1188_s8, %s911_s4  ;;  %s998_s13 = smov [#allocation7]  }
  0x5f   : > { %s915_s17 = sshll.u32 %s998_s13, 4  ;;  %s916_s17 = int_to_ptr.vmem [resolvable:$false] %s915_s17 }
  0x60   : > { %335 = vperm.xlu0 %841, %v181_v8   ;;  %p913_p10 = pnand %p912_p8, %p1250_p9  ;;  %s917_s29 = scalar_lea.vmem %s916_s17, 32 }
  0x61   : > { %339 = vperm.xlu1 %842, %v182_v9   ;;  %723 = vmatmul.mubr.msk.f32.gmra.mrb[2].mxu0 %vm188_vm0, %v180_v7  ;;  %p918_p4 = scmp.lt.s32.totalorder %s1188_s8, %s916_s17  ;;  %p919_p0 = scmp.lt.s32.totalorder %s917_s29, %s911_s4 }
  0x62   : > { %725 = vmatprep.mubr.msk.f32.mxu0 %vm188_vm0, %v181_v8  ;;  %p914_p1 = pneg %p913_p10 }
  0x63   : > { %p920_p5 = por %p919_p0, %p918_p4 }
  0x64   : > { %343 = vperm.xlu0 %841, %v183_v10  }
  0x65   : > { %347 = vperm.xlu1 %842, %v184_v11   ;;  %726 = vmatmul.mubr.msk.f32.gmra.mrb[4].mxu0 %vm188_vm0, %v182_v9  ;;  %p921_p11 = pnand %p920_p5, %p914_p1 }
  0x66   : > { %728 = vmatprep.mubr.msk.f32.mxu0 %vm188_vm0, %v183_v10 }
  0x68   : > { %843 = vset.pattern.permute.xlu0 %v992_v15 }
  0x69   : > { %729 = vmatmul.mubr.msk.f32.gmra.mrb[6].mxu0 %vm188_vm0, %v184_v11  ;;  %844 = vset.pattern.permute.xlu1 %v993_v16 }
  0x6a   : > { %752 = vmatprep.mubr.msk.f32.mxu0 %vm990_vm1, %v991_v13  ;;  %384 = vperm.xlu0 %843, %v185_v14  }
  0x6b   : > { %466 = vperm.xlu1 %844, %v185_v14  }
  0x6e   : > { %846 = vset.pattern.permute.xlu0 %v996_v52 }
  0x6f   : > { %845 = vset.pattern.permute.xlu1 %v995_v51  ;;  %551 = vperm.xlu0 %846, %v186_v50  }
  0x70   : > { %473 = vperm.xlu1 %845, %v186_v50  }
  0x73   : > { %848 = vset.pattern.permute.xlu0 %v997_v54 }
  0x74   : > { %847 = vset.pattern.permute.xlu1 %v997_v54 }
  0x75   : > { %563 = vperm.xlu1 %847, %v187_v53  }
  0xd7   : > { %v320_v17 = vpop.permute.xlu0 %319 }
  0xd8   : > { %v328_v18 = vpop.permute.xlu1 %327 }
  0xdb   : > { %v324_v19 = vpop.permute.xlu0 %323 }
  0xdc   : > { %v332_v20 = vpop.permute.xlu1 %331 }
  0xdf   : > { %v336_v32 = vpop.permute.xlu0 %335 }
  0xe0   : > { %v340_v30 = vpop.permute.xlu1 %339 }
  0xe3   : > { %v344_v44 = vpop.permute.xlu0 %343 }
  0xe4   : > { %v348_v41 = vpop.permute.xlu1 %347 }
  0xe9   : > { %v385_v59 = vpop.permute.xlu0 %384 }
  0xea   : > { %v391_v60 = vmul.f32 %v390_v58, %v385_v59  ;;  %v467_v62 = vpop.permute.xlu1 %466 }
  0xee   : > { %v552_v8 = vpop.permute.xlu0 %551 }
  0xef   : > { %v474_v4 = vpop.permute.xlu1 %473 }
  0xf4   : > { %v564_v15 = vpop.permute.xlu1 %563 }
 0x130   : > { %v721_v21 = vpop.f32.mrb[0].mxu0 }
 0x131   : > { %v351_v22 = vsub.f32 %v721_v21, %v324_v19  ;;  %v279_v23 = vpop.f32.mrb[1].mxu0 }
 0x132   : > { %v350_v24 = vsub.f32 %v279_v23, %v320_v17 }
 0x133   : > { %v359_v25 = vand.u32 2147483647, %v351_v22 }
 0x134   : > { %v358_v26 = vand.u32 2147483647, %v350_v24  ;;  %v724_v27 = vpop.f32.mrb[2].mxu0 }
 0x135   : > { %vm367_vm2 = vcmp.lt.f32.partialorder %v359_v25, 0.5  ;;  %v353_v28 = vsub.f32 %v724_v27, %v332_v20  ;;  %v289_v29 = vpop.f32.mrb[3].mxu0 }
 0x136   : > { %vm366_vm3 = vcmp.lt.f32.partialorder %v358_v26, 0.5  ;;  %v352_v31 = vsub.f32 %v289_v29, %v328_v18 }
 0x137   : > { %v361_v33 = vand.u32 2147483647, %v353_v28  ;;  %vm760_vm4 = vmpackc.low %vm367_vm2, %vm366_vm3 }
 0x138   : > { %v360_v34 = vand.u32 2147483647, %v352_v31  ;;  %v727_v35 = vpop.f32.mrb[4].mxu0  ;;  %761 = vmatpush3.bf16.msk.msra.mxu1 %vm760_vm4, %v994_v36 }
 0x139   : > { %vm369_vm5 = vcmp.lt.f32.partialorder %v361_v33, 0.5  ;;  %v355_v37 = vsub.f32 %v727_v35, %v340_v30  ;;  %v299_v38 = vpop.f32.mrb[5].mxu0  ;;  %762 = vmatprep.subr.bf16.mxu1 %v989_v12 }
 0x13a   : > { %vm368_vm6 = vcmp.lt.f32.partialorder %v360_v34, 0.5  ;;  %v354_v39 = vsub.f32 %v299_v38, %v336_v32 }
 0x13b   : > { %vm763_vm7 = vmpackc.low %vm369_vm5, %vm368_vm6  ;;  %v363_v40 = vand.u32 2147483647, %v355_v37 }
 0x13c   : > { %v362_v42 = vand.u32 2147483647, %v354_v39  ;;  %v730_v43 = vpop.f32.mrb[6].mxu0  ;;  %764 = vmatpush3.bf16.msk.msra.mxu1 %vm763_vm7, %v994_v36 }
 0x13d   : > { %vm371_vm8 = vcmp.lt.f32.partialorder %v363_v40, 0.5  ;;  %v357_v45 = vsub.f32 %v730_v43, %v348_v41  ;;  %v309_v46 = vpop.f32.mrb[7].mxu0  ;;  %765 = vmatprep.subr.bf16.mxu1 %v989_v12 }
 0x13e   : > { %vm370_vm9 = vcmp.lt.f32.partialorder %v362_v42, 0.5  ;;  %v356_v47 = vsub.f32 %v309_v46, %v344_v44 }
 0x13f   : > { %vm766_vm10 = vmpackc.low %vm371_vm8, %vm370_vm9  ;;  %v365_v48 = vand.u32 2147483647, %v357_v45 }
 0x140   : > { %v364_v49 = vand.u32 2147483647, %v356_v47  ;;  %767 = vmatpush3.bf16.msk.msra.mxu1 %vm766_vm10, %v994_v36 }
 0x141   : > { %vm373_vm11 = vcmp.lt.f32.partialorder %v365_v48, 0.5  ;;  %768 = vmatprep.subr.bf16.mxu1 %v989_v12 }
 0x142   : > { %vm372_vm12 = vcmp.lt.f32.partialorder %v364_v49, 0.5 }
 0x143   : > { %vm769_vm13 = vmpackc.low %vm373_vm11, %vm372_vm12 }
 0x144   : > { %770 = vmatpush3.bf16.msk.msra.mxu1 %vm769_vm13, %v994_v36 }
 0x147   : > { %748 = vmatmul.mubr.msk.f32.vlgmr.msra.gmra.mrb[0].mxu1 %vm392_vm14, %v185_v14 }
 0x21a   : > { %v461_v61 = vpop.f32.mrb[0].mxu1 }
 0x21b   : > { %v462_v63 = vadd.f32 %v461_v61, %v391_v60  ;;  %v749_v0 = vpop.f32.mrb[1].mxu1 }
 0x21d   : > { %v469_v1 = vadd.f32 %v467_v62, %v462_v63 }
 0x21f   : > { %v470_v3 = vmax.f32 %v469_v1, 0.0 }
 0x221   : > { %751 = vmatpush3.msra.mxu0 %v470_v3 }
 0x222   : > { %753 = vmatmul.mubr.msk.f32.vlgmr.msra.gmra.mrb[8].mxu0 %vm476_vm15, %v186_v50 }
 0x2f5   : > { %v545_v5 = vpop.f32.mrb[8].mxu0 }
 0x2f6   : > { %v546_v6 = vadd.f32 %v545_v5, %v474_v4  ;;  %v754_v7 = vpop.f32.mrb[9].mxu0 }
 0x2f8   : > { %v549_v9 = vmax.f32 %v546_v6, 0.0 }
 0x2fa   : > { %v554_v2 = vmul.f32 %v552_v8, %v549_v9 }
 0x2fc   : > { %v555_v10 = vrot.slane %v554_v2, 4 }
 0x2fe   : > { %v556_v11 = vadd.f32 %v555_v10, %v554_v2 }
 0x300   : > { %v557_v12 = vrot.slane %v556_v11, 2 }
 0x302   : > { %v558_v13 = vadd.f32 %v557_v12, %v556_v11 }
 0x304   : > { %v559_v14 = vrot.slane %v558_v13, 1 }
 0x306   : > { %v560_v16 = vadd.f32 %v559_v14, %v558_v13 }
 0x308   : > { %v566_v17 = vadd.f32 %v564_v15, %v560_v16 }
 0x30a   : > { %v690_v18 = vmul.f32 -1.442695, %v566_v17 }
 0x30c   : > { %849 = vpow2.f32 %v690_v18 }
 0x316   : > { %v850_v19 = vpop.eup %849 }
 0x317   : > { %v570_v20 = vadd.f32 1.0, %v850_v19 }
 0x319   : > { %851 = vrcp.f32 %v570_v20 }
 0x323   : > { %v852_v21 = vpop.eup %851 }
 0x324   : > { %573 = vst [vmem:[%s174_s23] sm:$0x1] %v852_v21 }
 0x325   : > { %924 = shalt.err (!%p921_p11)
}
 0x326   : > { %s925_s27 = scalar_lea.hbm %s1186_s26, 16  ;;  %s929_s3 = scalar_lea.hbm %s1232_s2, 32 }
 0x327   : > { %p926_p13 = scmp.ne.s32.totalorder %s1186_s26, %s925_s27  ;;  %p930_p12 = scmp.lt.u32.totalorder %s1186_s26, %s1232_s2 }
 0x328   : > { %p931_p7 = scmp.lt.u32.totalorder %s929_s3, %s925_s27  ;;  %p933_p8 = scmp.lt.u32.totalorder %s925_s27, %s1186_s26 }
 0x329   : > { %p927_p2 = pnand %p926_p13, %p1250_p9 }
 0x32a   : > { %p932_p3 = por %p931_p7, %p930_p12 }
 0x32b   : > { %p928_p6 = pneg %p927_p2 }
 0x32c   : > { %p934_p10 = por %p933_p8, %p932_p3 }
 0x32e   : > { %p935_p1 = pnand %p934_p10, %p928_p6 }
 0x330   : > { %938 = shalt.err (!%p935_p1)
}
 0x331   : > { %777 = dma.vmem_to_hbm [thread:$0]  (%p1250_p9), %s1188_s8, 16, %s1186_s26, %s575_s19  }
 0x332 PF: > { %s599_s6 = sand.u32 1, %s969_s9   ;;  %p1251_p4 = scmp.ne.s32.totalorder %s1240_s22, 0 }
 0x333   : > { %p1252_p0 = scmp.ge.s32.totalorder %s981_s12, 2  ;;  %s600_s7 = scalar_lea.sflag [#allocation4], %s599_s6 }
 0x335   : > { %p788_p5 = pnand %p1252_p0, %p1251_p4 }
 0x337   : > { %964 = dma.done.wait (!%p788_p5), %s600_s7, 16  }
 0x338   : > { %966 = vsyncadd (!%p788_p5), %s600_s7, 4294967280  ;;  %p16_p11 = scmp.ge.s32.totalorder %s1039_s15, 4   ;;  %s1253_s9 = smov %s973_s10 }
 0x339   : > { %s1254_s10 = smov %s977_s11  ;;  %s1255_s11 = smov %s1051_s18 }
 0x33a   : > { %s1256_s12 = smov %s1039_s15  ;;  %18 = sbr.rel (!%p16_p11) target bundleno = 6 (0x6), region = 77 }
 0x341   :  { %604 = vsyncpa [#allocation3], 1 }
 0x342   :  { %606 = vsyncpa [#allocation3 + $0x1], 1 }
 0x343   :  { %607 = vsyncpa [#allocation6], 1 }
 0x344   :  { %608 = vsyncpa [#allocation4], 1 }
 0x345   :  { %610 = vsyncpa [#allocation4 + $0x1], 1 }

</bundles_post_ra>
